<compile_context>
chip_gen: v7x
topology: tpu7x:2x2x1
jax: 0.10.0
libtpu: 0.0.40
codegen_flags: <defaults>
</compile_context>

<pallas_src>
import jax
import jax.numpy as jnp
from jax.experimental import pallas as pl
from jax.experimental.pallas import tpu as pltpu

LANE = 128


# ----------------------------- Pallas kernel --------------------------------
def fraud_gnn_kernel(a_ref, x_ref, pa_ref, w1_ref, b1_ref, w2_ref, b2_ref,
                     wc_ref, bc_ref, out_ref):
    bf16 = jnp.bfloat16

    # ---- GCN layer 1:  H1 = relu(A_bd @ (X @ W1) + b1) ----
    # X is stacked over the TP problems of this step; A_bd is block-diagonal, so one
    # (TP*N, TP*N) x (TP*N, H) matmul performs all TP per-problem aggregations at once.
    xw = jnp.dot(x_ref[...].astype(bf16), w1_ref[...],
                 preferred_element_type=jnp.float32)                 # (TP*N, H)
    h1 = jnp.dot(a_ref[...], xw.astype(bf16),
                 preferred_element_type=jnp.float32)                 # (TP*N, H)
    h1 = jnp.maximum(h1 + b1_ref[...], 0.0)                          # f32 elementwise

    # F.dropout(p=0.2, training=False) -> identity in inference.
    # TODO(synk): training-mode stochastic dropout (pltpu.prng_*) not implemented.

    # ---- GCN layer 2 + global_mean_pool (pool hoisted through the aggregation) ----
    #   pooled = P @ (A @ H1 @ W2 + b2) = (PA @ H1) @ W2 + b2   (pool rows sum to 1)
    pooled = jnp.dot(pa_ref[...], h1.astype(bf16),
                     preferred_element_type=jnp.float32)             # (TP*G, H)
    pooled = jnp.dot(pooled.astype(bf16), w2_ref[...],
                     preferred_element_type=jnp.float32) + b2_ref[...]

    # ---- classifier (lane-padded to 128):  out = pooled @ Wc_pad + bc_pad ----
    out_ref[...] = (jnp.dot(pooled.astype(bf16), wc_ref[...],
                            preferred_element_type=jnp.float32) + bc_ref[...])


# ----------------------------- host helpers ----------------------------------
def _block_diag_stack(mats):
    """mats: (S, TP, r, c) -> (S*TP*r, TP*c), block-diagonal within each step."""
    S, TP, r, c = mats.shape
    eye = jnp.eye(TP, dtype=mats.dtype)
    bd = jnp.einsum('ij,siab->siajb', eye, mats)      # broadcast multiply, exact
    return bd.reshape(S * TP * r, TP * c)


def fraud_gnn_forward(a_hat_b, x_b, w1, b1, w2, b2, p_b, wc, bc, *,
                      problems_per_step=16):
    """Batched forward: a_hat_b [P,N,N], x_b [P,N,F], p_b [P,G,N] -> logits [P,G,C].

    problems_per_step (TP): 16 -> 256-row adjacency tiles (v6e/v7x MXU); use 8 on v5e.
    """
    P, N, _ = a_hat_b.shape
    F = x_b.shape[-1]
    H = w1.shape[1]
    G = p_b.shape[1]
    C = wc.shape[1]
    C_pad = max(LANE, ((C + LANE - 1) // LANE) * LANE)

    TP = min(problems_per_step, P)
    assert P % TP == 0, "P must be divisible by problems_per_step"
    S = P // TP                      # grid steps (keep >=2 on v7x for megacore)
    TPN = TP * N
    TPG = TP * G

    bf16 = jnp.bfloat16
    f32 = jnp.float32

    # Pool hoisted through layer-2 aggregation: PA = P_pool @ A_hat  (f32 product).
    pa_b = jnp.einsum('pgn,pnm->pgm', p_b.astype(f32), a_hat_b.astype(f32))

    # Block-diagonal packing per step, built directly in bf16 (no extra cast pass).
    a_bd = _block_diag_stack(a_hat_b.astype(bf16).reshape(S, TP, N, N))   # (S*TPN, TPN)
    pa_bd = _block_diag_stack(pa_b.astype(bf16).reshape(S, TP, G, N))     # (S*TPG, TPN)
    x_stack = x_b.astype(f32).reshape(S * TPN, F)                         # cast in-kernel

    w1_b = w1.astype(bf16)
    w2_b = w2.astype(bf16)
    wc_pad = jnp.zeros((H, C_pad), bf16).at[:, :C].set(wc.astype(bf16))
    bc_pad = jnp.zeros((1, C_pad), f32).at[:, :C].set(bc.astype(f32))
    b1_f = b1.astype(f32).reshape(1, H)
    b2_f = b2.astype(f32).reshape(1, H)

    flops = S * (2 * TPN * F * H + 2 * TPN * TPN * H + 2 * TPG * TPN * H
                 + 2 * TPG * H * H + 2 * TPG * H * C_pad)
    bytes_accessed = (a_bd.size * 2 + pa_bd.size * 2 + x_stack.size * 4
                      + w1_b.size * 2 + w2_b.size * 2 + wc_pad.size * 2
                      + b1_f.size * 4 + b2_f.size * 4 + bc_pad.size * 4
                      + S * TPG * C_pad * 4)

    out = pl.pallas_call(
        fraud_gnn_kernel,
        out_shape=jax.ShapeDtypeStruct((S * TPG, C_pad), f32),
        grid=(S,),
        in_specs=[
            pl.BlockSpec((TPN, TPN), lambda i: (i, 0)),   # block-diag A_hat (per step)
            pl.BlockSpec((TPN, F), lambda i: (i, 0)),     # stacked X (f32)
            pl.BlockSpec((TPG, TPN), lambda i: (i, 0)),   # block-diag PA = P_pool @ A_hat
            pl.BlockSpec((F, H), lambda i: (0, 0)),       # W1  (resident)
            pl.BlockSpec((1, H), lambda i: (0, 0)),       # b1
            pl.BlockSpec((H, H), lambda i: (0, 0)),       # W2
            pl.BlockSpec((1, H), lambda i: (0, 0)),       # b2
            pl.BlockSpec((H, C_pad), lambda i: (0, 0)),   # Wc (lane-padded)
            pl.BlockSpec((1, C_pad), lambda i: (0, 0)),   # bc (lane-padded)
        ],
        out_specs=pl.BlockSpec((TPG, C_pad), lambda i: (i, 0)),
        compiler_params=pltpu.CompilerParams(
            dimension_semantics=("parallel",)),
        cost_estimate=pl.CostEstimate(
            flops=flops, transcendentals=0, bytes_accessed=bytes_accessed),
    )(a_bd, x_stack, pa_bd, w1_b, b1_f, w2_b, b2_f, wc_pad, bc_pad)

    return out.reshape(P, G, C_pad)[:, :, :C]


# ----------------------------- JAX glue --------------------------------------
def build_normalized_adjacency(edge_index, num_nodes):
    """Dense GCN-normalized adjacency with self loops:
       A_hat[i, j] = deg(i)^-1/2 * deg(j)^-1/2 for edge j -> i (and i == j)."""
    src, dst = edge_index[0], edge_index[1]
    loop = jnp.arange(num_nodes, dtype=src.dtype)
    src = jnp.concatenate([src, loop])
    dst = jnp.concatenate([dst, loop])
    deg = jnp.zeros((num_nodes,), jnp.float32).at[dst].add(1.0)
    dinv = jnp.where(deg > 0, 1.0 / jnp.sqrt(deg), 0.0)
    vals = dinv[src] * dinv[dst]
    a_hat = jnp.zeros((num_nodes, num_nodes), jnp.float32).at[dst, src].add(vals)
    return a_hat


def build_mean_pool_matrix(batch, num_graphs):
    onehot = (batch[None, :] == jnp.arange(num_graphs)[:, None]).astype(jnp.float32)
    counts = jnp.maximum(onehot.sum(axis=1, keepdims=True), 1.0)
    return onehot / counts


def glorot(key, shape):
    fan_in, fan_out = shape
    limit = jnp.sqrt(6.0 / (fan_in + fan_out))
    return jax.random.uniform(key, shape, jnp.float32, -limit, limit)


# ----------------------------- references (plain JAX) -------------------------
def reference_forward_f32(a, x, w1, b1, w2, b2, p, wc, bc):
    h = jnp.maximum(a @ (x @ w1) + b1, 0.0)
    h = a @ (h @ w2) + b2
    pooled = p @ h
    return pooled @ wc + bc


def reference_forward_bf16(a, x, w1, b1, w2, b2, p, wc, bc):
    """Mimics the kernel's compute path (bf16 MXU inputs, f32 accumulate, pool hoist)."""
    bf = jnp.bfloat16

    def mm(lhs, rhs):
        return jnp.dot(lhs.astype(bf), rhs.astype(bf),
                       preferred_element_type=jnp.float32)

    h = jnp.maximum(mm(a, mm(x, w1)) + b1, 0.0)
    pa = p @ a                                  # f32, as built in the wrapper
    pooled = mm(mm(pa, h), w2) + b2
    return mm(pooled, wc) + bc


if __name__ == "__main__":
    # small shapes consistent with the module
    num_nodes = 16       # N
    num_features = 8     # num_features
    hidden = 32          # hidden_channels
    num_classes = 2
    num_graphs = 2       # two graphs of 8 nodes each
    num_problems = 32    # P independent problems batched into one pallas_call
    problems_per_step = 16   # TP: 256-row MXU tiles (use 8 on v5e); grid = (P/TP,) = (2,)

    key = jax.random.PRNGKey(0)
    k_x, k_w1, k_w2, k_wc, k_bc = jax.random.split(key, 5)

    # per-problem node features
    x_b = jax.random.normal(k_x, (num_problems, num_nodes, num_features), jnp.float32)

    # graph structure: two disjoint bidirectional rings of 8 nodes (shared across problems)
    def ring_edges(offset, n):
        a = jnp.arange(n, dtype=jnp.int32) + offset
        b = (jnp.arange(n, dtype=jnp.int32) + 1) % n + offset
        return jnp.stack([jnp.concatenate([a, b]), jnp.concatenate([b, a])])

    edge_index = jnp.concatenate(
        [ring_edges(0, 8), ring_edges(8, 8)], axis=1)          # [2, 32]
    batch = jnp.concatenate(
        [jnp.zeros(8, jnp.int32), jnp.ones(8, jnp.int32)])     # [16]

    # deterministic parameters (GCNConv: glorot weight, zero bias; Linear: uniform bias)
    w1 = glorot(k_w1, (num_features, hidden))
    b1 = jnp.zeros((1, hidden), jnp.float32)
    w2 = glorot(k_w2, (hidden, hidden))
    b2 = jnp.zeros((1, hidden), jnp.float32)
    wc = glorot(k_wc, (hidden, num_classes))          # classifier weight (as W^T)
    bc = jax.random.uniform(k_bc, (1, num_classes), jnp.float32,
                            -1.0 / jnp.sqrt(hidden), 1.0 / jnp.sqrt(hidden))

    a_hat = build_normalized_adjacency(edge_index, num_nodes)
    p_pool = build_mean_pool_matrix(batch, num_graphs)
    a_hat_b = jnp.tile(a_hat[None], (num_problems, 1, 1))       # [P, N, N]
    p_b = jnp.tile(p_pool[None], (num_problems, 1, 1))          # [P, G, N]

    out = fraud_gnn_forward(a_hat_b, x_b, w1, b1, w2, b2, p_b, wc, bc,
                            problems_per_step=problems_per_step)
    out = jax.block_until_ready(out)

    ref_bf16 = jax.vmap(
        lambda a, x, p: reference_forward_bf16(a, x, w1, b1, w2, b2, p, wc, bc)
    )(a_hat_b, x_b, p_b)
    ref_f32 = jax.vmap(
        lambda a, x, p: reference_forward_f32(a, x, w1, b1, w2, b2, p, wc, bc)
    )(a_hat_b, x_b, p_b)

    assert out.shape == (num_problems, num_graphs, num_classes)
    assert jnp.allclose(out, ref_bf16, atol=2e-2, rtol=2e-2), (out, ref_bf16)
    assert jnp.allclose(out, ref_f32, atol=6e-2, rtol=6e-2), (out, ref_f32)

    print("KERNEL_OK")
</pallas_src>

<mosaic_0001>
module attributes {stable_mosaic.version = 11 : i64} {
  func.func @fraud_gnn_kernel(%arg0: i32, %arg1: memref<256x256xbf16, #tpu.memory_space<vmem>>, %arg2: memref<256x8xf32, #tpu.memory_space<vmem>>, %arg3: memref<32x256xbf16, #tpu.memory_space<vmem>>, %arg4: memref<8x32xbf16, #tpu.memory_space<vmem>>, %arg5: memref<1x32xf32, #tpu.memory_space<vmem>>, %arg6: memref<32x32xbf16, #tpu.memory_space<vmem>>, %arg7: memref<1x32xf32, #tpu.memory_space<vmem>>, %arg8: memref<32x128xbf16, #tpu.memory_space<vmem>>, %arg9: memref<1x128xf32, #tpu.memory_space<vmem>>, %arg10: memref<32x128xf32, #tpu.memory_space<vmem>>) attributes {dimension_semantics = [#tpu.dimension_semantics<parallel>], iteration_bounds = array<i64: 2>, scalar_prefetch = 0 : i64, scratch_operands = 0 : i64, tpu.core_type = #tpu.core_type<tc>, window_params = [{transform_indices = @transform_0, window_bounds = array<i64: 256, 256>}, {transform_indices = @transform_1, window_bounds = array<i64: 256, 8>}, {transform_indices = @transform_2, window_bounds = array<i64: 32, 256>}, {pipeline_mode = #tpu.pipeline_mode<synchronous>, transform_indices = @transform_3, window_bounds = array<i64: 8, 32>}, {pipeline_mode = #tpu.pipeline_mode<synchronous>, transform_indices = @transform_4, window_bounds = array<i64: 1, 32>}, {pipeline_mode = #tpu.pipeline_mode<synchronous>, transform_indices = @transform_5, window_bounds = array<i64: 32, 32>}, {pipeline_mode = #tpu.pipeline_mode<synchronous>, transform_indices = @transform_6, window_bounds = array<i64: 1, 32>}, {pipeline_mode = #tpu.pipeline_mode<synchronous>, transform_indices = @transform_7, window_bounds = array<i64: 32, 128>}, {pipeline_mode = #tpu.pipeline_mode<synchronous>, transform_indices = @transform_8, window_bounds = array<i64: 1, 128>}, {transform_indices = @transform_9, window_bounds = array<i64: 32, 128>}]} {
    %c0 = arith.constant 0 : index
    %c0_0 = arith.constant 0 : index
    %0 = vector.load %arg2[%c0, %c0_0] : memref<256x8xf32, #tpu.memory_space<vmem>>, vector<256x8xf32>
    %1 = arith.truncf %0 : vector<256x8xf32> to vector<256x8xbf16>
    %c0_1 = arith.constant 0 : index
    %c0_2 = arith.constant 0 : index
    %2 = vector.load %arg4[%c0_1, %c0_2] : memref<8x32xbf16, #tpu.memory_space<vmem>>, vector<8x32xbf16>
    %cst = arith.constant dense<0.000000e+00> : vector<256x32xf32>
    %3 = tpu.matmul %1, %2, %cst {dimension_numbers = #tpu.dot_dimension_numbers<[1], [0], [0], [1], [0, 0, 1, 1], [], []>} : vector<256x8xbf16>, vector<8x32xbf16>, vector<256x32xf32> -> vector<256x32xf32>
    %c0_3 = arith.constant 0 : index
    %c0_4 = arith.constant 0 : index
    %4 = vector.load %arg1[%c0_3, %c0_4] : memref<256x256xbf16, #tpu.memory_space<vmem>>, vector<256x256xbf16>
    %5 = arith.truncf %3 : vector<256x32xf32> to vector<256x32xbf16>
    %cst_5 = arith.constant dense<0.000000e+00> : vector<256x32xf32>
    %6 = tpu.matmul %4, %5, %cst_5 {dimension_numbers = #tpu.dot_dimension_numbers<[1], [0], [0], [1], [0, 0, 1, 1], [], []>} : vector<256x256xbf16>, vector<256x32xbf16>, vector<256x32xf32> -> vector<256x32xf32>
    %c0_6 = arith.constant 0 : index
    %c0_7 = arith.constant 0 : index
    %7 = vector.load %arg5[%c0_6, %c0_7] : memref<1x32xf32, #tpu.memory_space<vmem>>, vector<1x32xf32>
    %8 = vector.broadcast %7 : vector<1x32xf32> to vector<256x32xf32>
    %9 = arith.addf %6, %8 : vector<256x32xf32>
    %cst_8 = arith.constant 0.000000e+00 : f32
    %10 = vector.broadcast %cst_8 : f32 to vector<256x32xf32>
    %11 = arith.maximumf %9, %10 : vector<256x32xf32>
    %c0_9 = arith.constant 0 : index
    %c0_10 = arith.constant 0 : index
    %12 = vector.load %arg3[%c0_9, %c0_10] : memref<32x256xbf16, #tpu.memory_space<vmem>>, vector<32x256xbf16>
    %13 = arith.truncf %11 : vector<256x32xf32> to vector<256x32xbf16>
    %cst_11 = arith.constant dense<0.000000e+00> : vector<32x32xf32>
    %14 = tpu.matmul %12, %13, %cst_11 {dimension_numbers = #tpu.dot_dimension_numbers<[1], [0], [0], [1], [0, 0, 1, 1], [], []>} : vector<32x256xbf16>, vector<256x32xbf16>, vector<32x32xf32> -> vector<32x32xf32>
    %15 = arith.truncf %14 : vector<32x32xf32> to vector<32x32xbf16>
    %c0_12 = arith.constant 0 : index
    %c0_13 = arith.constant 0 : index
    %16 = vector.load %arg6[%c0_12, %c0_13] : memref<32x32xbf16, #tpu.memory_space<vmem>>, vector<32x32xbf16>
    %cst_14 = arith.constant dense<0.000000e+00> : vector<32x32xf32>
    %17 = tpu.matmul %15, %16, %cst_14 {dimension_numbers = #tpu.dot_dimension_numbers<[1], [0], [0], [1], [0, 0, 1, 1], [], []>} : vector<32x32xbf16>, vector<32x32xbf16>, vector<32x32xf32> -> vector<32x32xf32>
    %c0_15 = arith.constant 0 : index
    %c0_16 = arith.constant 0 : index
    %18 = vector.load %arg7[%c0_15, %c0_16] : memref<1x32xf32, #tpu.memory_space<vmem>>, vector<1x32xf32>
    %19 = vector.broadcast %18 : vector<1x32xf32> to vector<32x32xf32>
    %20 = arith.addf %17, %19 : vector<32x32xf32>
    %21 = arith.truncf %20 : vector<32x32xf32> to vector<32x32xbf16>
    %c0_17 = arith.constant 0 : index
    %c0_18 = arith.constant 0 : index
    %22 = vector.load %arg8[%c0_17, %c0_18] : memref<32x128xbf16, #tpu.memory_space<vmem>>, vector<32x128xbf16>
    %cst_19 = arith.constant dense<0.000000e+00> : vector<32x128xf32>
    %23 = tpu.matmul %21, %22, %cst_19 {dimension_numbers = #tpu.dot_dimension_numbers<[1], [0], [0], [1], [0, 0, 1, 1], [], []>} : vector<32x32xbf16>, vector<32x128xbf16>, vector<32x128xf32> -> vector<32x128xf32>
    %c0_20 = arith.constant 0 : index
    %c0_21 = arith.constant 0 : index
    %24 = vector.load %arg9[%c0_20, %c0_21] : memref<1x128xf32, #tpu.memory_space<vmem>>, vector<1x128xf32>
    %25 = vector.broadcast %24 : vector<1x128xf32> to vector<32x128xf32>
    %26 = arith.addf %23, %25 : vector<32x128xf32>
    %c0_22 = arith.constant 0 : index
    %c0_23 = arith.constant 0 : index
    %27 = vector.load %arg10[%c0_22, %c0_23] : memref<32x128xf32, #tpu.memory_space<vmem>>, vector<32x128xf32>
    tpu.vector_store %arg10[%c0_22, %c0_23], %26 {strides = array<i32>} : memref<32x128xf32, #tpu.memory_space<vmem>>, vector<32x128xf32>,
    return
  }
  func.func @transform_0(%arg0: i32) -> (i32, i32) {
    %c0_i32 = arith.constant 0 : i32
    %c0_i32_0 = arith.constant 0 : i32
    return %arg0, %c0_i32 : i32, i32
  }
  func.func @transform_1(%arg0: i32) -> (i32, i32) {
    %c0_i32 = arith.constant 0 : i32
    %c0_i32_0 = arith.constant 0 : i32
    return %arg0, %c0_i32 : i32, i32
  }
  func.func @transform_2(%arg0: i32) -> (i32, i32) {
    %c0_i32 = arith.constant 0 : i32
    %c0_i32_0 = arith.constant 0 : i32
    return %arg0, %c0_i32 : i32, i32
  }
  func.func @transform_3(%arg0: i32) -> (i32, i32) {
    %c0_i32 = arith.constant 0 : i32
    %c0_i32_0 = arith.constant 0 : i32
    %c0_i32_1 = arith.constant 0 : i32
    return %c0_i32, %c0_i32_0 : i32, i32
  }
  func.func @transform_4(%arg0: i32) -> (i32, i32) {
    %c0_i32 = arith.constant 0 : i32
    %c0_i32_0 = arith.constant 0 : i32
    %c0_i32_1 = arith.constant 0 : i32
    return %c0_i32, %c0_i32_0 : i32, i32
  }
  func.func @transform_5(%arg0: i32) -> (i32, i32) {
    %c0_i32 = arith.constant 0 : i32
    %c0_i32_0 = arith.constant 0 : i32
    %c0_i32_1 = arith.constant 0 : i32
    return %c0_i32, %c0_i32_0 : i32, i32
  }
  func.func @transform_6(%arg0: i32) -> (i32, i32) {
    %c0_i32 = arith.constant 0 : i32
    %c0_i32_0 = arith.constant 0 : i32
    %c0_i32_1 = arith.constant 0 : i32
    return %c0_i32, %c0_i32_0 : i32, i32
  }
  func.func @transform_7(%arg0: i32) -> (i32, i32) {
    %c0_i32 = arith.constant 0 : i32
    %c0_i32_0 = arith.constant 0 : i32
    %c0_i32_1 = arith.constant 0 : i32
    return %c0_i32, %c0_i32_0 : i32, i32
  }
  func.func @transform_8(%arg0: i32) -> (i32, i32) {
    %c0_i32 = arith.constant 0 : i32
    %c0_i32_0 = arith.constant 0 : i32
    %c0_i32_1 = arith.constant 0 : i32
    return %c0_i32, %c0_i32_0 : i32, i32
  }
  func.func @transform_9(%arg0: i32) -> (i32, i32) {
    %c0_i32 = arith.constant 0 : i32
    %c0_i32_0 = arith.constant 0 : i32
    return %arg0, %c0_i32 : i32, i32
  }
}

</mosaic_0001>

<bundles_post_ra>
// kernel: tpu_custom_call.1
= control target key start
LH: loop header
LB: loop body
LE: loop exit
PB: predicated region body
PF: predicated region fallthrough
CT: control target
= control target key end

     0   :  { %14 = vsyncpa [#allocation3], 0  ;;  %s2359_s0 = inlined_call_operand.vmem [shape: bf16[512,256], index: 0, kind: input, shape index: {}]   ;;  %s2360_s1 = inlined_call_operand.vmem [shape: f32[512,8], index: 1, kind: input, shape index: {}]   ;;  %s2361_s2 = inlined_call_operand.hbm [shape: bf16[64,256], index: 2, kind: input, shape index: {}]   ;;  %s2362_s3 = inlined_call_operand.vmem [shape: bf16[8,32], index: 3, kind: input, shape index: {}]   ;;  %s2363_s4 = inlined_call_operand.vmem [shape: f32[1,32], index: 4, kind: input, shape index: {}]   ;;  %s2364_s5 = inlined_call_operand.vmem [shape: bf16[32,32], index: 5, kind: input, shape index: {}]   ;;  %s2365_s6 = inlined_call_operand.vmem [shape: f32[1,32], index: 6, kind: input, shape index: {}]   ;;  %s2366_s7 = inlined_call_operand.vmem [shape: bf16[32,128], index: 7, kind: input, shape index: {}]   ;;  %s2367_s8 = inlined_call_operand.vmem [shape: f32[1,128], index: 8, kind: input, shape index: {}]   ;;  %s2368_s9 = inlined_call_operand.hbm [shape: f32[64,128], index: 9, kind: output, shape index: {}]  }
   0x1   :  { %16 = vsyncpa [#allocation3 + $0x1], 0 }
   0x2   :  { %17 = vsyncpa [#allocation4], 0 }
   0x3   :  { %19 = vsyncpa [#allocation4 + $0x1], 0  ;;  %s2003_s30 = smov 0   ;;  %s2005_s10 = smov 0  }
   0x4   :  { %s2007_s11 = smov 0   ;;  %s2009_s12 = smov 0  }
   0x5 LB: > { %s2024_s13 = sadd.s32 4294967295, %s1945_s12   ;;  %s1438_s14 = sadd.s32 4294967294, %s1945_s12   ;;  %s1945_s12 = sphi %s2009_s12, %s2381_s12   ;;  %s1941_s11 = sphi %s2007_s11, %s2380_s11   ;;  %s1937_s10 = sphi %s2005_s10, %s2379_s10   ;;  %s1933_s30 = sphi %s2003_s30, %s2378_s30  }
   0x6   : > { %s2028_s15 = sadd.s32 1, %s1945_s12   ;;  %s84_s16 = sadd.s32 1, %s1941_s11 }
   0x7   : > { %s81_s17 = ssub.s32 %s1945_s12, %s2028_s15  ;;  %p91_p0 = scmp.ne.s32.totalorder %s1941_s11, %s1937_s10 }
   0x8   : > { %p82_p1 = scmp.eq.s32.totalorder %s81_s17, 0  ;;  %p92_p2 = scmp.eq.s32.totalorder %s1945_s12, 0 }
   0x9   : > { %p97_p3 = scmp.ne.s32.totalorder %s1937_s10, %s1933_s30  ;;  %p98_p4 = scmp.eq.s32.totalorder %s2024_s13, 0 }
   0xa   : > { %s2040_s18 = scalar_select %p82_p1, %s1941_s11, %s84_s16  }
   0xb   : > { %p2042_p5 = por %p92_p2, %p91_p0  ;;  %p2046_p6 = por %p98_p4, %p97_p3 }
   0xc   : > { %p247_p7 = scmp.eq.s32.totalorder %s2024_s13, 1  ;;  %p253_p8 = scmp.eq.s32.totalorder %s1438_s14, 1 }
   0xd   : > { %p1753_p10 = scmp.lt.s32.totalorder %s1945_s12, 2  ;;  %s310_s23 = sand.u32 1, %s1941_s11  }
   0xe   : > { %p2053_p11 = por %p247_p7, %p91_p0  ;;  %p2057_p12 = por %p253_p8, %p97_p3 }
   0xf   : > { %s1522_s24 = sshll.u32 %s1945_s12, 9  ;;  %s1441_s25 = sshll.u32 %s310_s23, 5 }
  0x10   : > { %s2372_s21 = scalar_select %p2053_p11, 1, 0 }
  0x11   : > { %s2373_s22 = scalar_select %p2057_p12, 1, 0 }
  0x12   : > { %s2066_s28 = scalar_lea.hbm %s2361_s2, %s1522_s24  ;;  %s314_s29 = scalar_lea.vmem [#allocation2], %s1441_s25 }
  0x13   : > { %s322_s14 = sshll.u32 %s314_s29, 4  ;;  %p2070_p13 = pnand %p1753_p10, %p2042_p5  ;;  %s2074_s14 = int_to_ptr.vmem [resolvable:$true] %s322_s14 }
  0x14   : > { %s2076_s17 = scalar_lea.sflag [#allocation3], %s310_s23  ;;  %s1849_s26 = scalar_lea.hbm %s2066_s28, 512 }
  0x15   : > { %p1850_p0 = scmp.ne.s32.totalorder %s2066_s28, %s1849_s26  ;;  %p1851_p1 = pneg %p2070_p13 }
  0x16   : > { %s1854_s25 = scalar_lea.hbm %s2361_s2, 1024  ;;  %p1855_p4 = scmp.lt.u32.totalorder %s2066_s28, %s2361_s2 }
  0x17   : > { %p1852_p2 = pnand %p1851_p1, %p1850_p0  ;;  %p1856_p5 = scmp.lt.u32.totalorder %s1854_s25, %s1849_s26 }
  0x18   : > { %p1858_p8 = scmp.lt.u32.totalorder %s1849_s26, %s2066_s28 }
  0x19   : > { %p1853_p3 = pneg %p1852_p2  ;;  %p1857_p7 = por %p1856_p5, %p1855_p4 }
  0x1b   : > { %p1859_p10 = por %p1858_p8, %p1857_p7 }
  0x1d   : > { %p1860_p9 = pnand %p1859_p10, %p1853_p3 }
  0x1f   : > { %1863 = shalt.err (!%p1860_p9)
}
  0x20   : > { %s1864_s23 = scalar_lea.vmem %s2074_s14, 512  ;;  %s1947_s24 = smov [#allocation2]  }
  0x21   : > { %p1865_p0 = scmp.ne.s32.totalorder %s2074_s14, %s1864_s23  ;;  %s1869_s19 = sshll.u32 %s1947_s24, 4  ;;  %s1870_s19 = int_to_ptr.vmem [resolvable:$false] %s1869_s19 }
  0x22   : > { %s1871_s27 = scalar_lea.vmem %s1870_s19, 1024  ;;  %p1872_p11 = scmp.lt.s32.totalorder %s2074_s14, %s1870_s19 }
  0x23   : > { %p1867_p2 = pnand %p1865_p0, %p1851_p1  ;;  %p1873_p4 = scmp.lt.s32.totalorder %s1871_s27, %s1864_s23 }
  0x25   : > { %p1868_p12 = pneg %p1867_p2  ;;  %p1874_p5 = por %p1873_p4, %p1872_p11 }
  0x27   : > { %p1875_p7 = pnand %p1874_p5, %p1868_p12 }
  0x29   : > { %1878 = shalt.err (!%p1875_p7)
}
  0x2a   : > { %s1948_s26 = smov 128   ;;  %s1949_s25 = smov 8  }
  0x2b   : > { %1748 = dma.hbm_to_vmem [thread:$0]  (!%p2070_p13), %s2066_s28, 512, %s2074_s14, %s2076_s17, %s1948_s26, %s1948_s26, %s1949_s25  }
  0x2c   : > { %p1445_p9 = scmp.ge.s32.totalorder %s1945_s12, 1  ;;  %p330_p1 = scmp.lt.s32.totalorder %s1945_s12, 3 }
  0x2e   : > { %p331_p3 = pnand %p1445_p9, %p330_p1 }
  0x2f   : > { %s2107_s29 = sand.u32 (!%p331_p3), 1, %s1937_s10  }
  0x30   : > { %334 = sbr.rel (%p331_p3) target bundleno = 1373 (0x55d), region = 56  ;;  %s1446_s23 = sshll.u32 (!%p331_p3), %s2107_s29, 5 }
  0x31   : > { %s337_s24 = scalar_lea.sflag (!%p331_p3), [#allocation3], %s2107_s29  ;;  %s2113_s19 = scalar_lea.vmem (!%p331_p3), [#allocation2], %s1446_s23 }
  0x37   : > { %1924 = dma.done.wait (%p2046_p6), %s337_s24, 512  }
  0x38   : > { %1926 = vsyncadd (%p2046_p6), %s337_s24, 4294966784  ;;  %s1448_s28 = sshll.u32 %s2024_s13, 5  ;;  %vm500_vm0 = vcmask 1043456   ;;  %v450_v0 = vld [vmem:[%s2362_s3] sm:$0xf]  ;;  %vm451_vm1 = vcmask 64512  }
  0x39   : > { %p387_p11 = scmp.lt.s32.totalorder %s1448_s28, 63  ;;  %1740 = vmatprep.subr.msk.bf16.mxu0 %vm500_vm0, %v450_v0  ;;  %v502_v3 = vsel %vm500_vm0, %v450_v0, 0  ;;  %vm1187_vm2 = vcmask 261120   ;;  %s385_s26 = scalar_lea.vmem [#allocation5], %s1446_s23 }
  0x3a   : > { %1691 = vmatpush3.bf16.msra.mxu0 %v502_v3  ;;  %s1341_s25 = sshll.u32 %s385_s26, 4  ;;  %p2375_p12 = scmp.ne.s32.totalorder %s2372_s21, 0  ;;  %s2310_s25 = int_to_ptr.vmem [resolvable:$true] %s1341_s25 }
  0x3b   : > { %s2383_s28 = smov (!%p387_p11, %s1448_s28), 63 }
  0x3c   : > { %s1523_s14 = sshll.u32 %s2383_s28, 3  ;;  %s1950_s28 = smov [#allocation5]  }
  0x3d   : > { %s2128_s27 = scalar_lea.vmem %s2360_s1, %s1523_s14  ;;  %s2186_s16 = scalar_lea.vmem %s2359_s0, %s1523_s14 }
  0x3e   : > { %v402_v1 = vld [vmem:[%s2128_s27] sm:$0xff]  ;;  %v403_v2 = vld [vmem:[%s2128_s27 + $0x8] sm:$0xff]  ;;  %v404_v5 = vld [vmem:[%s2128_s27 + $0x10] sm:$0xff]  ;;  %s1883_s14 = sshll.u32 %s1950_s28, 4  ;;  %s1884_s14 = int_to_ptr.vmem [resolvable:$false] %s1883_s14 }
  0x3f   : > { %v434_v4 = vpack.c.bf16 %v403_v2, %v402_v1  ;;  %v405_v6 = vld [vmem:[%s2128_s27 + $0x18] sm:$0xff]  ;;  %v406_v7 = vld [vmem:[%s2128_s27 + $0x20] sm:$0xff]  ;;  %v407_v9 = vld [vmem:[%s2128_s27 + $0x28] sm:$0xff]  ;;  %s1885_s17 = scalar_lea.vmem %s1884_s14, 1024  ;;  %p1886_p10 = scmp.lt.s32.totalorder %s2310_s25, %s1884_s14 }
  0x40   : > { %v435_v8 = vpack.c.bf16 %v405_v6, %v404_v5  ;;  %v436_v10 = vpack.c.bf16 %v407_v9, %v406_v7  ;;  %v408_v11 = vld [vmem:[%s2128_s27 + $0x30] sm:$0xff]  ;;  %v409_v12 = vld [vmem:[%s2128_s27 + $0x38] sm:$0xff]  ;;  %v410_v13 = vld [vmem:[%s2128_s27 + $0x40] sm:$0xff] }
  0x41   : > { %1692 = vmatprep.mubr.msk.bf16.mxu0 %vm451_vm1, %v434_v4  ;;  %v411_v14 = vld [vmem:[%s2128_s27 + $0x48] sm:$0xff]  ;;  %v437_v15 = vpack.c.bf16 %v409_v12, %v408_v11  ;;  %v412_v17 = vld [vmem:[%s2128_s27 + $0x50] sm:$0xff]  ;;  %v413_v18 = vld [vmem:[%s2128_s27 + $0x58] sm:$0xff] }
  0x42   : > { %1693 = vmatmul.mubr.msk.bf16.vlgmr.msra.gmra.mrb[0].mxu0 %vm451_vm1, %v435_v8  ;;  %v438_v16 = vpack.c.bf16 %v411_v14, %v410_v13  ;;  %v414_v19 = vld [vmem:[%s2128_s27 + $0x60] sm:$0xff]  ;;  %v415_v20 = vld [vmem:[%s2128_s27 + $0x68] sm:$0xff]  ;;  %v439_v21 = vpack.c.bf16 %v413_v18, %v412_v17  ;;  %v416_v23 = vld [vmem:[%s2128_s27 + $0x70] sm:$0xff] }
  0x43   : > { %1696 = vmatprep.mubr.msk.bf16.mxu0 %vm451_vm1, %v436_v10  ;;  %v440_v22 = vpack.c.bf16 %v415_v20, %v414_v19  ;;  %v417_v24 = vld [vmem:[%s2128_s27 + $0x78] sm:$0xff]  ;;  %v418_v25 = vld [vmem:[%s2128_s27 + $0x80] sm:$0xff]  ;;  %v419_v26 = vld [vmem:[%s2128_s27 + $0x88] sm:$0xff] }
  0x44   : > { %v441_v27 = vpack.c.bf16 %v417_v24, %v416_v23  ;;  %v442_v28 = vpack.c.bf16 %v419_v26, %v418_v25  ;;  %v420_v29 = vld [vmem:[%s2128_s27 + $0x90] sm:$0xff]  ;;  %v421_v30 = vld [vmem:[%s2128_s27 + $0x98] sm:$0xff]  ;;  %v422_v31 = vld [vmem:[%s2128_s27 + $0xa0] sm:$0xff] }
  0x45   : > { %v423_v32 = vld [vmem:[%s2128_s27 + $0xa8] sm:$0xff]  ;;  %v443_v33 = vpack.c.bf16 %v421_v30, %v420_v29  ;;  %v424_v35 = vld [vmem:[%s2128_s27 + $0xb0] sm:$0xff]  ;;  %v425_v36 = vld [vmem:[%s2128_s27 + $0xb8] sm:$0xff] }
  0x46   : > { %v444_v34 = vpack.c.bf16 %v423_v32, %v422_v31  ;;  %v426_v37 = vld [vmem:[%s2128_s27 + $0xc0] sm:$0xff]  ;;  %v427_v38 = vld [vmem:[%s2128_s27 + $0xc8] sm:$0xff]  ;;  %v445_v39 = vpack.c.bf16 %v425_v36, %v424_v35  ;;  %v428_v41 = vld [vmem:[%s2128_s27 + $0xd0] sm:$0xff] }
  0x47   : > { %v446_v40 = vpack.c.bf16 %v427_v38, %v426_v37  ;;  %v429_v42 = vld [vmem:[%s2128_s27 + $0xd8] sm:$0xff]  ;;  %v430_v43 = vld [vmem:[%s2128_s27 + $0xe0] sm:$0xff]  ;;  %v431_v44 = vld [vmem:[%s2128_s27 + $0xe8] sm:$0xff] }
  0x48   : > { %v447_v45 = vpack.c.bf16 %v429_v42, %v428_v41  ;;  %v448_v46 = vpack.c.bf16 %v431_v44, %v430_v43  ;;  %v432_v47 = vld [vmem:[%s2128_s27 + $0xf0] sm:$0xff]  ;;  %v433_v48 = vld [vmem:[%s2128_s27 + $0xf8] sm:$0xff]  ;;  %v1793_v50 = vld [vmem:[%s2186_s16 + $0x4] ss:$8 sps:$4 sm:$0xff]  }
  0x49   : > { %v449_v49 = vpack.c.bf16 %v433_v48, %v432_v47  ;;  %912 = vmatprep.mubr.bf16.mxu1 %v1793_v50  ;;  %v1791_v35 = vld [vmem:[%s2186_s16] ss:$8 sps:$4 sm:$0xff]   ;;  %v1794_v36 = vld [vmem:[%s2186_s16 + $0x14] ss:$8 sps:$4 sm:$0xff]   ;;  %v1796_v37 = vld [vmem:[%s2186_s16 + $0x10] ss:$8 sps:$4 sm:$0xff]  }
  0x4a   : > { %1697 = vmatmul.mubr.msk.bf16.gmra.mrb[4].mxu0 %vm451_vm1, %v437_v15  ;;  %v1797_v38 = vld [vmem:[%s2186_s16 + $0x24] ss:$8 sps:$4 sm:$0xff]   ;;  %v1802_v41 = vld [vmem:[%s2186_s16 + $0x30] ss:$8 sps:$4 sm:$0xff]   ;;  %v1805_v43 = vld [vmem:[%s2186_s16 + $0x40] ss:$8 sps:$4 sm:$0xff]  }
  0x4b   : > { %1700 = vmatprep.mubr.msk.bf16.mxu0 %vm451_vm1, %v438_v16  ;;  %v1803_v42 = vld [vmem:[%s2186_s16 + $0x44] ss:$8 sps:$4 sm:$0xff]   ;;  %v1806_v44 = vld [vmem:[%s2186_s16 + $0x54] ss:$8 sps:$4 sm:$0xff]   ;;  %v1811_v47 = vld [vmem:[%s2186_s16 + $0x60] ss:$8 sps:$4 sm:$0xff]  }
  0x4c   : > { %v1812_v48 = vld [vmem:[%s2186_s16 + $0x74] ss:$8 sps:$4 sm:$0xff]   ;;  %v1815_v50 = vld [vmem:[%s2186_s16 + $0x84] ss:$8 sps:$4 sm:$0xff]  }
  0x52   : > { %1701 = vmatmul.mubr.msk.bf16.gmra.mrb[8].mxu0 %vm451_vm1, %v439_v21 }
  0x53   : > { %1704 = vmatprep.mubr.msk.bf16.mxu0 %vm451_vm1, %v440_v22 }
  0x5a   : > { %1705 = vmatmul.mubr.msk.bf16.gmra.mrb[12].mxu0 %vm451_vm1, %v441_v27 }
  0x5b   : > { %1708 = vmatprep.mubr.msk.bf16.mxu0 %vm451_vm1, %v442_v28 }
  0x62   : > { %1709 = vmatmul.mubr.msk.bf16.gmra.mrb[16].mxu0 %vm451_vm1, %v443_v33 }
  0x63   : > { %1712 = vmatprep.mubr.msk.bf16.mxu0 %vm451_vm1, %v444_v34 }
  0x6a   : > { %1713 = vmatmul.mubr.msk.bf16.gmra.mrb[20].mxu0 %vm451_vm1, %v445_v39  ;;  %v1799_v39 = vld [vmem:[%s2186_s16 + $0x20] ss:$8 sps:$4 sm:$0xff]  }
  0x6b   : > { %1716 = vmatprep.mubr.msk.bf16.mxu0 %vm451_vm1, %v446_v40  ;;  %v1800_v40 = vld [vmem:[%s2186_s16 + $0x34] ss:$8 sps:$4 sm:$0xff]  }
  0x72   : > { %1717 = vmatmul.mubr.msk.bf16.gmra.mrb[24].mxu0 %vm451_vm1, %v447_v45  ;;  %v1808_v45 = vld [vmem:[%s2186_s16 + $0x50] ss:$8 sps:$4 sm:$0xff]  }
  0x73   : > { %1720 = vmatprep.mubr.msk.bf16.mxu0 %vm451_vm1, %v448_v46  ;;  %v1809_v46 = vld [vmem:[%s2186_s16 + $0x64] ss:$8 sps:$4 sm:$0xff]  }
  0x7a   : > { %1721 = vmatmul.mubr.msk.bf16.gmra.mrb[28].mxu0 %vm451_vm1, %v449_v49  ;;  %v1814_v49 = vld [vmem:[%s2186_s16 + $0x70] ss:$8 sps:$4 sm:$0xff]  }
 0x115   : > { %v1694_v51 = vpop.f32.mrb[0].mxu0 }
 0x116   : > { %v538_v52 = vpop.f32.mrb[1].mxu0 }
 0x117   : > { %v1695_v53 = vpop.f32.mrb[2].mxu0 }
 0x118   : > { %v698_v54 = vpack.c.bf16 %v1695_v53, %v1694_v51  ;;  %v541_v55 = vpop.f32.mrb[3].mxu0  ;;  %v1817_v51 = vld [vmem:[%s2186_s16 + $0x80] ss:$8 sps:$4 sm:$0xff]   ;;  %v1820_v53 = vld [vmem:[%s2186_s16 + $0x90] ss:$8 sps:$4 sm:$0xff]  }
 0x119   : > { %v697_v56 = vpack.c.bf16 %v541_v55, %v538_v52  ;;  %v1818_v52 = vld [vmem:[%s2186_s16 + $0x94] ss:$8 sps:$4 sm:$0xff]   ;;  %v1823_v55 = vld [vmem:[%s2186_s16 + $0xa0] ss:$8 sps:$4 sm:$0xff]  }
 0x11d   : > { %v1698_v57 = vpop.f32.mrb[4].mxu0 }
 0x11e   : > { %v554_v58 = vpop.f32.mrb[5].mxu0 }
 0x11f   : > { %v1699_v59 = vpop.f32.mrb[6].mxu0 }
 0x120   : > { %v700_v60 = vpack.c.bf16 %v1699_v59, %v1698_v57  ;;  %v557_v61 = vpop.f32.mrb[7].mxu0  ;;  %v1826_v57 = vld [vmem:[%s2186_s16 + $0xb0] ss:$8 sps:$4 sm:$0xff]   ;;  %v1829_v59 = vld [vmem:[%s2186_s16 + $0xc0] ss:$8 sps:$4 sm:$0xff]  }
 0x121   : > { %v699_v62 = vpack.c.bf16 %v557_v61, %v554_v58  ;;  %v1827_v58 = vld [vmem:[%s2186_s16 + $0xc4] ss:$8 sps:$4 sm:$0xff]   ;;  %v1832_v61 = vld [vmem:[%s2186_s16 + $0xd0] ss:$8 sps:$4 sm:$0xff]  }
 0x125   : > { %v1702_v63 = vpop.f32.mrb[8].mxu0 }
 0x126   : > { %v570_v0 = vpop.f32.mrb[9].mxu0 }
 0x127   : > { %v1703_v1 = vpop.f32.mrb[10].mxu0 }
 0x128   : > { %v702_v2 = vpack.c.bf16 %v1703_v1, %v1702_v63  ;;  %v573_v3 = vpop.f32.mrb[11].mxu0  ;;  %v1835_v63 = vld [vmem:[%s2186_s16 + $0xe0] ss:$8 sps:$4 sm:$0xff]   ;;  %v1838_v1 = vld [vmem:[%s2186_s16 + $0xf0] ss:$8 sps:$4 sm:$0xff]  }
 0x129   : > { %v701_v4 = vpack.c.bf16 %v573_v3, %v570_v0  ;;  %v1836_v0 = vld [vmem:[%s2186_s16 + $0xf4] ss:$8 sps:$4 sm:$0xff]   ;;  %v2223_v3 = vld [vmem:[%s2363_s4] ss:$0 sm:$0xff] }
 0x12d   : > { %v1706_v5 = vpop.f32.mrb[12].mxu0 }
 0x12e   : > { %v586_v6 = vpop.f32.mrb[13].mxu0 }
 0x12f   : > { %v1707_v7 = vpop.f32.mrb[14].mxu0 }
 0x130   : > { %v704_v8 = vpack.c.bf16 %v1707_v7, %v1706_v5  ;;  %v589_v9 = vpop.f32.mrb[15].mxu0 }
 0x131   : > { %v703_v10 = vpack.c.bf16 %v589_v9, %v586_v6 }
 0x135   : > { %v1710_v11 = vpop.f32.mrb[16].mxu0 }
 0x136   : > { %v602_v12 = vpop.f32.mrb[17].mxu0 }
 0x137   : > { %v1711_v13 = vpop.f32.mrb[18].mxu0 }
 0x138   : > { %v706_v14 = vpack.c.bf16 %v1711_v13, %v1710_v11  ;;  %v605_v15 = vpop.f32.mrb[19].mxu0 }
 0x139   : > { %v705_v16 = vpack.c.bf16 %v605_v15, %v602_v12 }
 0x13b   : > { %1542 = vmatprep.subr.bf16.mxu1 %v705_v16 }
 0x13c   : > { %1543 = vmatpush3.bf16.msra.mxu1 %v697_v56  ;;  %v1824_v56 = vld [vmem:[%s2186_s16 + $0xb4] ss:$8 sps:$4 sm:$0xff]  }
 0x13d   : > { %v1714_v17 = vpop.f32.mrb[20].mxu0  ;;  %1544 = vmatprep.subr.bf16.mxu1 %v706_v14 }
 0x13e   : > { %v618_v18 = vpop.f32.mrb[21].mxu0 }
 0x13f   : > { %v1715_v19 = vpop.f32.mrb[22].mxu0 }
 0x140   : > { %v708_v20 = vpack.c.bf16 %v1715_v19, %v1714_v17  ;;  %v621_v21 = vpop.f32.mrb[23].mxu0  ;;  %1545 = vmatpush3.bf16.msra.mxu1 %v698_v54  ;;  %v1821_v54 = vld [vmem:[%s2186_s16 + $0xa4] ss:$8 sps:$4 sm:$0xff]  }
 0x141   : > { %v707_v22 = vpack.c.bf16 %v621_v21, %v618_v18 }
 0x143   : > { %1546 = vmatprep.subr.bf16.mxu1 %v707_v22 }
 0x144   : > { %1547 = vmatpush3.bf16.msra.mxu1 %v699_v62  ;;  %v1833_v62 = vld [vmem:[%s2186_s16 + $0xe4] ss:$8 sps:$4 sm:$0xff]  }
 0x145   : > { %v1718_v23 = vpop.f32.mrb[24].mxu0  ;;  %1548 = vmatprep.subr.bf16.mxu1 %v708_v20 }
 0x146   : > { %v634_v24 = vpop.f32.mrb[25].mxu0 }
 0x147   : > { %v1719_v25 = vpop.f32.mrb[26].mxu0 }
 0x148   : > { %v710_v26 = vpack.c.bf16 %v1719_v25, %v1718_v23  ;;  %v637_v27 = vpop.f32.mrb[27].mxu0  ;;  %1549 = vmatpush3.bf16.msra.mxu1 %v700_v60  ;;  %v1830_v60 = vld [vmem:[%s2186_s16 + $0xd4] ss:$8 sps:$4 sm:$0xff]   ;;  %s1879_s16 = scalar_lea.vmem %s2310_s25, 512 }
 0x149   : > { %v709_v28 = vpack.c.bf16 %v637_v27, %v634_v24  ;;  %p1880_p6 = scmp.ne.s32.totalorder %s2310_s25, %s1879_s16  ;;  %p1887_p0 = scmp.lt.s32.totalorder %s1885_s17, %s1879_s16 }
 0x14b   : > { %1550 = vmatprep.subr.bf16.mxu1 %v709_v28  ;;  %p1881_p13 = pnand %p1880_p6, %p2375_p12  ;;  %p1888_p2 = por %p1887_p0, %p1886_p10 }
 0x14c   : > { %1551 = vmatpush3.bf16.msra.mxu1 %v701_v4 }
 0x14d   : > { %v1722_v29 = vpop.f32.mrb[28].mxu0  ;;  %1552 = vmatprep.subr.bf16.mxu1 %v710_v26  ;;  %p1882_p8 = pneg %p1881_p13 }
 0x14e   : > { %v650_v30 = vpop.f32.mrb[29].mxu0 }
 0x14f   : > { %v1723_v31 = vpop.f32.mrb[30].mxu0  ;;  %p1889_p4 = pnand %p1888_p2, %p1882_p8 }
 0x150   : > { %v712_v32 = vpack.c.bf16 %v1723_v31, %v1722_v29  ;;  %v653_v33 = vpop.f32.mrb[31].mxu0  ;;  %1553 = vmatpush3.bf16.msra.mxu1 %v702_v2 }
 0x151   : > { %v711_v34 = vpack.c.bf16 %v653_v33, %v650_v30 }
 0x153   : > { %1554 = vmatprep.subr.bf16.mxu1 %v711_v34 }
 0x154   : > { %1555 = vmatpush3.bf16.msra.mxu1 %v703_v10  ;;  %v1841_v10 = vld [vmem:[%s2113_s19 + $0x4] ss:$8 sps:$4 sm:$0xff]  }
 0x155   : > { %1556 = vmatprep.subr.bf16.mxu1 %v712_v32  ;;  %1145 = vmatprep.mubr.bf16.mxu0 %v1841_v10 }
 0x158   : > { %1557 = vmatpush3.bf16.msra.mxu1 %v704_v8 }
 0x15b   : > { %913 = vmatmul.mubr.bf16.vlgmr.msra.gmra.mrb[0].mxu1 %v1791_v35 }
 0x15c   : > { %920 = vmatprep.mubr.bf16.mxu1 %v1794_v36 }
 0x163   : > { %921 = vmatmul.mubr.bf16.gmra.mrb[4].mxu1 %v1796_v37 }
 0x164   : > { %928 = vmatprep.mubr.bf16.mxu1 %v1797_v38 }
 0x16b   : > { %929 = vmatmul.mubr.bf16.gmra.mrb[8].mxu1 %v1799_v39 }
 0x16c   : > { %936 = vmatprep.mubr.bf16.mxu1 %v1800_v40 }
 0x173   : > { %937 = vmatmul.mubr.bf16.gmra.mrb[12].mxu1 %v1802_v41 }
 0x174   : > { %944 = vmatprep.mubr.bf16.mxu1 %v1803_v42 }
 0x17b   : > { %945 = vmatmul.mubr.bf16.gmra.mrb[16].mxu1 %v1805_v43 }
 0x17c   : > { %952 = vmatprep.mubr.bf16.mxu1 %v1806_v44 }
 0x183   : > { %953 = vmatmul.mubr.bf16.gmra.mrb[20].mxu1 %v1808_v45 }
 0x184   : > { %960 = vmatprep.mubr.bf16.mxu1 %v1809_v46 }
 0x18b   : > { %961 = vmatmul.mubr.bf16.gmra.mrb[24].mxu1 %v1811_v47 }
 0x18c   : > { %968 = vmatprep.mubr.bf16.mxu1 %v1812_v48 }
 0x193   : > { %969 = vmatmul.mubr.bf16.gmra.mrb[28].mxu1 %v1814_v49 }
 0x194   : > { %976 = vmatprep.mubr.bf16.mxu1 %v1815_v50 }
 0x19b   : > { %977 = vmatmul.mubr.bf16.gmra.mrb[32].mxu1 %v1817_v51 }
 0x19c   : > { %984 = vmatprep.mubr.bf16.mxu1 %v1818_v52 }
 0x1a3   : > { %985 = vmatmul.mubr.bf16.gmra.mrb[36].mxu1 %v1820_v53 }
 0x1a4   : > { %992 = vmatprep.mubr.bf16.mxu1 %v1821_v54 }
 0x1ab   : > { %993 = vmatmul.mubr.bf16.gmra.mrb[40].mxu1 %v1823_v55 }
 0x1ac   : > { %1000 = vmatprep.mubr.bf16.mxu1 %v1824_v56 }
 0x1b3   : > { %1001 = vmatmul.mubr.bf16.gmra.mrb[44].mxu1 %v1826_v57 }
 0x1b4   : > { %1008 = vmatprep.mubr.bf16.mxu1 %v1827_v58 }
 0x1bb   : > { %1009 = vmatmul.mubr.bf16.gmra.mrb[48].mxu1 %v1829_v59 }
 0x1bc   : > { %1016 = vmatprep.mubr.bf16.mxu1 %v1830_v60 }
 0x1c3   : > { %1017 = vmatmul.mubr.bf16.gmra.mrb[52].mxu1 %v1832_v61 }
 0x1c4   : > { %1024 = vmatprep.mubr.bf16.mxu1 %v1833_v62 }
 0x1cb   : > { %1025 = vmatmul.mubr.bf16.gmra.mrb[56].mxu1 %v1835_v63 }
 0x1cc   : > { %1032 = vmatprep.mubr.bf16.mxu1 %v1836_v0 }
 0x1d3   : > { %1033 = vmatmul.mubr.bf16.gmra.mrb[60].mxu1 %v1838_v1 }
 0x22e   : > { %v1558_v2 = vpop.f32.mrb[0].mxu1 }
 0x22f   : > { %v1559_v4 = vpop.f32.mrb[1].mxu1 }
 0x230   : > { %v1560_v5 = vadd.f32 %v1559_v4, %v1558_v2  ;;  %v1561_v6 = vpop.f32.mrb[2].mxu1 }
 0x231   : > { %v1562_v7 = vpop.f32.mrb[3].mxu1 }
 0x232   : > { %v915_v8 = vadd.f32 %v1560_v5, %v2223_v3  ;;  %v1563_v9 = vadd.f32 %v1562_v7, %v1561_v6 }
 0x234   : > { %v918_v11 = vadd.f32 %v1563_v9, %v2223_v3  ;;  %v1041_v12 = vmax.f32 %v915_v8, 0.0 }
 0x236   : > { %v1042_v13 = vmax.f32 %v918_v11, 0.0  ;;  %v1564_v14 = vpop.f32.mrb[4].mxu1 }
 0x237   : > { %v1565_v15 = vpop.f32.mrb[5].mxu1 }
 0x238   : > { %v2228_v16 = vpack.c.bf16 %v1042_v13, %v1041_v12  ;;  %v1566_v17 = vadd.f32 %v1565_v15, %v1564_v14  ;;  %v1567_v18 = vpop.f32.mrb[6].mxu1 }
 0x239   : > { %v1568_v19 = vpop.f32.mrb[7].mxu1 }
 0x23a   : > { %v923_v20 = vadd.f32 %v1566_v17, %v2223_v3  ;;  %v1569_v21 = vadd.f32 %v1568_v19, %v1567_v18 }
 0x23c   : > { %v926_v22 = vadd.f32 %v1569_v21, %v2223_v3  ;;  %v1043_v23 = vmax.f32 %v923_v20, 0.0 }
 0x23e   : > { %v1044_v24 = vmax.f32 %v926_v22, 0.0  ;;  %v1570_v25 = vpop.f32.mrb[8].mxu1 }
 0x23f   : > { %v1571_v26 = vpop.f32.mrb[9].mxu1 }
 0x240   : > { %v2232_v27 = vpack.c.bf16 %v1044_v24, %v1043_v23  ;;  %v1572_v28 = vadd.f32 %v1571_v26, %v1570_v25  ;;  %v1573_v29 = vpop.f32.mrb[10].mxu1 }
 0x241   : > { %v1574_v30 = vpop.f32.mrb[11].mxu1 }
 0x242   : > { %v931_v31 = vadd.f32 %v1572_v28, %v2223_v3  ;;  %v1575_v32 = vadd.f32 %v1574_v30, %v1573_v29 }
 0x244   : > { %v934_v33 = vadd.f32 %v1575_v32, %v2223_v3  ;;  %v1045_v34 = vmax.f32 %v931_v31, 0.0 }
 0x246   : > { %v1046_v35 = vmax.f32 %v934_v33, 0.0  ;;  %v1576_v36 = vpop.f32.mrb[12].mxu1 }
 0x247   : > { %v1577_v37 = vpop.f32.mrb[13].mxu1 }
 0x248   : > { %v2236_v38 = vpack.c.bf16 %v1046_v35, %v1045_v34  ;;  %v1578_v39 = vadd.f32 %v1577_v37, %v1576_v36  ;;  %v1579_v40 = vpop.f32.mrb[14].mxu1 }
 0x249   : > { %v1580_v41 = vpop.f32.mrb[15].mxu1 }
 0x24a   : > { %v939_v42 = vadd.f32 %v1578_v39, %v2223_v3  ;;  %v1581_v43 = vadd.f32 %v1580_v41, %v1579_v40 }
 0x24c   : > { %v942_v44 = vadd.f32 %v1581_v43, %v2223_v3  ;;  %v1047_v45 = vmax.f32 %v939_v42, 0.0 }
 0x24e   : > { %v1048_v46 = vmax.f32 %v942_v44, 0.0  ;;  %v1582_v47 = vpop.f32.mrb[16].mxu1 }
 0x24f   : > { %v1583_v48 = vpop.f32.mrb[17].mxu1 }
 0x250   : > { %v2240_v49 = vpack.c.bf16 %v1048_v46, %v1047_v45  ;;  %v1584_v50 = vadd.f32 %v1583_v48, %v1582_v47  ;;  %v1585_v51 = vpop.f32.mrb[18].mxu1 }
 0x251   : > { %v1586_v52 = vpop.f32.mrb[19].mxu1 }
 0x252   : > { %v947_v53 = vadd.f32 %v1584_v50, %v2223_v3  ;;  %v1587_v54 = vadd.f32 %v1586_v52, %v1585_v51 }
 0x254   : > { %v950_v55 = vadd.f32 %v1587_v54, %v2223_v3  ;;  %v1049_v56 = vmax.f32 %v947_v53, 0.0 }
 0x256   : > { %v1050_v57 = vmax.f32 %v950_v55, 0.0  ;;  %v1588_v58 = vpop.f32.mrb[20].mxu1 }
 0x257   : > { %v1589_v59 = vpop.f32.mrb[21].mxu1 }
 0x258   : > { %v2244_v60 = vpack.c.bf16 %v1050_v57, %v1049_v56  ;;  %v1590_v61 = vadd.f32 %v1589_v59, %v1588_v58  ;;  %v1591_v62 = vpop.f32.mrb[22].mxu1 }
 0x259   : > { %v1592_v63 = vpop.f32.mrb[23].mxu1 }
 0x25a   : > { %v955_v0 = vadd.f32 %v1590_v61, %v2223_v3  ;;  %v1593_v1 = vadd.f32 %v1592_v63, %v1591_v62 }
 0x25c   : > { %v958_v2 = vadd.f32 %v1593_v1, %v2223_v3  ;;  %v1051_v4 = vmax.f32 %v955_v0, 0.0 }
 0x25e   : > { %v1052_v5 = vmax.f32 %v958_v2, 0.0  ;;  %v1594_v6 = vpop.f32.mrb[24].mxu1 }
 0x25f   : > { %v1595_v7 = vpop.f32.mrb[25].mxu1 }
 0x260   : > { %v2248_v8 = vpack.c.bf16 %v1052_v5, %v1051_v4  ;;  %v1596_v9 = vadd.f32 %v1595_v7, %v1594_v6  ;;  %v1597_v10 = vpop.f32.mrb[26].mxu1 }
 0x261   : > { %v1598_v11 = vpop.f32.mrb[27].mxu1 }
 0x262   : > { %v963_v12 = vadd.f32 %v1596_v9, %v2223_v3  ;;  %v1599_v13 = vadd.f32 %v1598_v11, %v1597_v10 }
 0x264   : > { %v966_v14 = vadd.f32 %v1599_v13, %v2223_v3  ;;  %v1053_v15 = vmax.f32 %v963_v12, 0.0 }
 0x266   : > { %v1054_v17 = vmax.f32 %v966_v14, 0.0  ;;  %v1600_v18 = vpop.f32.mrb[28].mxu1 }
 0x267   : > { %v1601_v19 = vpop.f32.mrb[29].mxu1 }
 0x268   : > { %v2252_v20 = vpack.c.bf16 %v1054_v17, %v1053_v15  ;;  %v1602_v21 = vadd.f32 %v1601_v19, %v1600_v18  ;;  %v1603_v22 = vpop.f32.mrb[30].mxu1 }
 0x269   : > { %v1604_v23 = vpop.f32.mrb[31].mxu1 }
 0x26a   : > { %v971_v24 = vadd.f32 %v1602_v21, %v2223_v3  ;;  %v1605_v25 = vadd.f32 %v1604_v23, %v1603_v22 }
 0x26c   : > { %v974_v26 = vadd.f32 %v1605_v25, %v2223_v3  ;;  %v1055_v28 = vmax.f32 %v971_v24, 0.0 }
 0x26e   : > { %v1056_v29 = vmax.f32 %v974_v26, 0.0  ;;  %v1606_v30 = vpop.f32.mrb[32].mxu1 }
 0x26f   : > { %v1607_v31 = vpop.f32.mrb[33].mxu1 }
 0x270   : > { %v2256_v32 = vpack.c.bf16 %v1056_v29, %v1055_v28  ;;  %v1608_v33 = vadd.f32 %v1607_v31, %v1606_v30  ;;  %v1609_v34 = vpop.f32.mrb[34].mxu1 }
 0x271   : > { %v1610_v35 = vpop.f32.mrb[35].mxu1 }
 0x272   : > { %v979_v36 = vadd.f32 %v1608_v33, %v2223_v3  ;;  %v1611_v37 = vadd.f32 %v1610_v35, %v1609_v34 }
 0x274   : > { %v982_v39 = vadd.f32 %v1611_v37, %v2223_v3  ;;  %v1057_v40 = vmax.f32 %v979_v36, 0.0 }
 0x276   : > { %v1058_v41 = vmax.f32 %v982_v39, 0.0  ;;  %v1612_v42 = vpop.f32.mrb[36].mxu1 }
 0x277   : > { %v1613_v43 = vpop.f32.mrb[37].mxu1 }
 0x278   : > { %v1614_v44 = vadd.f32 %v1613_v43, %v1612_v42  ;;  %v1615_v45 = vpop.f32.mrb[38].mxu1  ;;  %v1085_v46 = vpack.c.bf16 %v1058_v41, %v1057_v40 }
 0x279   : > { %v1616_v47 = vpop.f32.mrb[39].mxu1 }
 0x27a   : > { %v987_v48 = vadd.f32 %v1614_v44, %v2223_v3  ;;  %v1617_v50 = vadd.f32 %v1616_v47, %v1615_v45  ;;  %1654 = vmatprep.subr.bf16.mxu0 %v1085_v46 }
 0x27b   : > { %1655 = vmatpush3.bf16.msra.mxu0 %v2228_v16 }
 0x27c   : > { %v990_v51 = vadd.f32 %v1617_v50, %v2223_v3  ;;  %v1059_v52 = vmax.f32 %v987_v48, 0.0 }
 0x27e   : > { %v1060_v53 = vmax.f32 %v990_v51, 0.0  ;;  %v1618_v54 = vpop.f32.mrb[40].mxu1 }
 0x27f   : > { %v1619_v55 = vpop.f32.mrb[41].mxu1 }
 0x280   : > { %v1620_v56 = vadd.f32 %v1619_v55, %v1618_v54  ;;  %v1621_v57 = vpop.f32.mrb[42].mxu1  ;;  %v1086_v58 = vpack.c.bf16 %v1060_v53, %v1059_v52 }
 0x281   : > { %v1622_v59 = vpop.f32.mrb[43].mxu1 }
 0x282   : > { %v995_v61 = vadd.f32 %v1620_v56, %v2223_v3  ;;  %v1623_v62 = vadd.f32 %v1622_v59, %v1621_v57  ;;  %1656 = vmatprep.subr.bf16.mxu0 %v1086_v58 }
 0x283   : > { %1657 = vmatpush3.bf16.msra.mxu0 %v2232_v27 }
 0x284   : > { %v998_v63 = vadd.f32 %v1623_v62, %v2223_v3  ;;  %v1061_v0 = vmax.f32 %v995_v61, 0.0  ;;  %v1839_v61 = vld [vmem:[%s2113_s19] ss:$8 sps:$4 sm:$0xff]   ;;  %v1842_v62 = vld [vmem:[%s2113_s19 + $0x14] ss:$8 sps:$4 sm:$0xff]  }
 0x286   : > { %v1062_v16 = vmax.f32 %v998_v63, 0.0  ;;  %v1624_v1 = vpop.f32.mrb[44].mxu1  ;;  %v1844_v63 = vld [vmem:[%s2113_s19 + $0x10] ss:$8 sps:$4 sm:$0xff]   ;;  %s1524_s19 = sshll.u32 %s2024_s13, 9  ;;  %s1328_s13 = scalar_lea.sflag [#allocation4], %s2107_s29 }
 0x287   : > { %v1625_v2 = vpop.f32.mrb[45].mxu1  ;;  %s2315_s23 = scalar_lea.hbm %s2368_s9, %s1524_s19 }
 0x288   : > { %v1626_v4 = vadd.f32 %v1625_v2, %v1624_v1  ;;  %v1627_v5 = vpop.f32.mrb[46].mxu1  ;;  %v1087_v6 = vpack.c.bf16 %v1062_v16, %v1061_v0  ;;  %v1845_v0 = vld [vmem:[%s2364_s5] sm:$0xff]  }
 0x289   : > { %v1628_v7 = vpop.f32.mrb[47].mxu1 }
 0x28a   : > { %v1003_v9 = vadd.f32 %v1626_v4, %v2223_v3  ;;  %v1629_v10 = vadd.f32 %v1628_v7, %v1627_v5  ;;  %1658 = vmatprep.subr.bf16.mxu0 %v1087_v6 }
 0x28b   : > { %1659 = vmatpush3.bf16.msra.mxu0 %v2236_v38 }
 0x28c   : > { %v1006_v11 = vadd.f32 %v1629_v10, %v2223_v3  ;;  %v1063_v12 = vmax.f32 %v1003_v9, 0.0 }
 0x28e   : > { %v1064_v27 = vmax.f32 %v1006_v11, 0.0  ;;  %v1630_v13 = vpop.f32.mrb[48].mxu1 }
 0x28f   : > { %v1631_v14 = vpop.f32.mrb[49].mxu1 }
 0x290   : > { %v1632_v15 = vadd.f32 %v1631_v14, %v1630_v13  ;;  %v1633_v17 = vpop.f32.mrb[50].mxu1  ;;  %v1088_v18 = vpack.c.bf16 %v1064_v27, %v1063_v12  ;;  %v1847_v13 = vld [vmem:[%s2366_s7] sm:$0xff]   ;;  %v1848_v14 = vld [vmem:[%s2366_s7 + $0x8] sm:$0xff]  }
 0x291   : > { %v1634_v19 = vpop.f32.mrb[51].mxu1 }
 0x292   : > { %v1011_v21 = vadd.f32 %v1632_v15, %v2223_v3  ;;  %v1635_v22 = vadd.f32 %v1634_v19, %v1633_v17  ;;  %1660 = vmatprep.subr.bf16.mxu0 %v1088_v18  ;;  %v1506_v17 = vld [vmem:[%s2365_s6] ss:$0 sm:$0xff] }
 0x293   : > { %1661 = vmatpush3.bf16.msra.mxu0 %v2240_v49 }
 0x294   : > { %v1014_v23 = vadd.f32 %v1635_v22, %v2223_v3  ;;  %v1065_v24 = vmax.f32 %v1011_v21, 0.0 }
 0x296   : > { %v1066_v38 = vmax.f32 %v1014_v23, 0.0  ;;  %v1636_v25 = vpop.f32.mrb[52].mxu1 }
 0x297   : > { %v1637_v26 = vpop.f32.mrb[53].mxu1 }
 0x298   : > { %v1638_v28 = vadd.f32 %v1637_v26, %v1636_v25  ;;  %v1639_v29 = vpop.f32.mrb[54].mxu1  ;;  %v1089_v30 = vpack.c.bf16 %v1066_v38, %v1065_v24 }
 0x299   : > { %v1640_v31 = vpop.f32.mrb[55].mxu1 }
 0x29a   : > { %v1019_v33 = vadd.f32 %v1638_v28, %v2223_v3  ;;  %v1641_v34 = vadd.f32 %v1640_v31, %v1639_v29  ;;  %1662 = vmatprep.subr.bf16.mxu0 %v1089_v30  ;;  %v1511_v28 = vld [vmem:[%s2367_s8] ss:$0 sm:$0xff] }
 0x29b   : > { %1663 = vmatpush3.bf16.msra.mxu0 %v2244_v60 }
 0x29c   : > { %v1022_v35 = vadd.f32 %v1641_v34, %v2223_v3  ;;  %v1067_v36 = vmax.f32 %v1019_v33, 0.0 }
 0x29e   : > { %v1068_v49 = vmax.f32 %v1022_v35, 0.0  ;;  %v1642_v37 = vpop.f32.mrb[56].mxu1 }
 0x29f   : > { %v1643_v39 = vpop.f32.mrb[57].mxu1 }
 0x2a0   : > { %v1644_v40 = vadd.f32 %v1643_v39, %v1642_v37  ;;  %v1645_v41 = vpop.f32.mrb[58].mxu1  ;;  %v1090_v42 = vpack.c.bf16 %v1068_v49, %v1067_v36 }
 0x2a1   : > { %v1646_v43 = vpop.f32.mrb[59].mxu1 }
 0x2a2   : > { %v1027_v44 = vadd.f32 %v1644_v40, %v2223_v3  ;;  %v1647_v45 = vadd.f32 %v1646_v43, %v1645_v41  ;;  %1664 = vmatprep.subr.bf16.mxu0 %v1090_v42 }
 0x2a3   : > { %1665 = vmatpush3.bf16.msra.mxu0 %v2248_v8 }
 0x2a4   : > { %v1030_v46 = vadd.f32 %v1647_v45, %v2223_v3  ;;  %v1069_v47 = vmax.f32 %v1027_v44, 0.0 }
 0x2a6   : > { %v1070_v60 = vmax.f32 %v1030_v46, 0.0  ;;  %v1648_v48 = vpop.f32.mrb[60].mxu1 }
 0x2a7   : > { %v1649_v50 = vpop.f32.mrb[61].mxu1 }
 0x2a8   : > { %v1650_v51 = vadd.f32 %v1649_v50, %v1648_v48  ;;  %v1651_v52 = vpop.f32.mrb[62].mxu1  ;;  %v1091_v53 = vpack.c.bf16 %v1070_v60, %v1069_v47 }
 0x2a9   : > { %v1652_v54 = vpop.f32.mrb[63].mxu1 }
 0x2aa   : > { %v1035_v55 = vadd.f32 %v1650_v51, %v2223_v3  ;;  %v1653_v56 = vadd.f32 %v1652_v54, %v1651_v52  ;;  %1666 = vmatprep.subr.bf16.mxu0 %v1091_v53 }
 0x2ab   : > { %1667 = vmatpush3.bf16.msra.mxu0 %v2252_v20 }
 0x2ac   : > { %v1038_v8 = vadd.f32 %v1653_v56, %v2223_v3  ;;  %v1071_v57 = vmax.f32 %v1035_v55, 0.0  ;;  %v1846_v3 = vld [vmem:[%s2364_s5 + $0x8] sm:$0xff]  }
 0x2ae   : > { %v1072_v58 = vmax.f32 %v1038_v8, 0.0 }
 0x2b0   : > { %v1092_v59 = vpack.c.bf16 %v1072_v58, %v1071_v57 }
 0x2b2   : > { %1668 = vmatprep.subr.bf16.mxu0 %v1092_v59 }
 0x2b3   : > { %1669 = vmatpush3.bf16.msra.mxu0 %v2256_v32 }
 0x2b4   : > { %1724 = vmatprep.subr.bf16.mxu0 %v1845_v0 }
 0x2b6   : > { %1146 = vmatmul.mubr.bf16.vlgmr.msra.gmra.mrb[32].mxu0 %v1839_v61 }
 0x2b7   : > { %1153 = vmatprep.mubr.bf16.mxu0 %v1842_v62  ;;  %1725 = vmatpush3.bf16.msra.mxu0 %v1845_v0 }
 0x2b8   : > { %1726 = vmatprep.subr.bf16.mxu0 %v1846_v3 }
 0x2bb   : > { %1727 = vmatpush3.bf16.msra.mxu0 %v1846_v3 }
 0x2bc   : > { %1732 = vmatprep.subr.bf16.mxu0 %v1847_v13 }
 0x2be   : > { %1154 = vmatmul.mubr.bf16.gmra.mrb[36].mxu0 %v1844_v63 }
 0x389   : > { %v1670_v20 = vpop.f32.mrb[32].mxu0 }
 0x38a   : > { %v1671_v16 = vpop.f32.mrb[33].mxu0 }
 0x38b   : > { %v1672_v32 = vadd.f32 %v1671_v16, %v1670_v20  ;;  %v1673_v1 = vpop.f32.mrb[34].mxu0 }
 0x38c   : > { %v1674_v2 = vpop.f32.mrb[35].mxu0 }
 0x38d   : > { %v1675_v4 = vadd.f32 %v1674_v2, %v1673_v1 }
 0x38f   : > { %v1162_v5 = vpack.c.bf16 %v1675_v4, %v1672_v32 }
 0x391   : > { %v1676_v6 = vpop.f32.mrb[36].mxu0  ;;  %1728 = vmatprep.mubr.msk.bf16.mxu0 %vm1187_vm2, %v1162_v5 }
 0x392   : > { %v1677_v7 = vpop.f32.mrb[37].mxu0 }
 0x393   : > { %v1678_v9 = vadd.f32 %v1677_v7, %v1676_v6  ;;  %v1679_v10 = vpop.f32.mrb[38].mxu0 }
 0x394   : > { %v1680_v11 = vpop.f32.mrb[39].mxu0 }
 0x395   : > { %v1681_v12 = vadd.f32 %v1680_v11, %v1679_v10 }
 0x397   : > { %v1163_v27 = vpack.c.bf16 %v1681_v12, %v1678_v9 }
 0x399   : > { %1729 = vmatmul.mubr.msk.bf16.vlgmr.msra.gmra.mrb[40].mxu0 %vm1187_vm2, %v1163_v27 }
 0x39a   : > { %1733 = vmatpush3.bf16.msra.mxu0 %v1847_v13 }
 0x39b   : > { %1734 = vmatprep.subr.bf16.mxu0 %v1848_v14 }
 0x39e   : > { %1735 = vmatpush3.bf16.msra.mxu0 %v1848_v14 }
 0x46c   : > { %v1730_v15 = vpop.f32.mrb[40].mxu0 }
 0x46d   : > { %v1228_v18 = vpop.f32.mrb[41].mxu0  ;;  %v1237_v21 = vadd.f32 %v1730_v15, %v1506_v17 }
 0x46e   : > { %v1731_v19 = vpop.f32.mrb[42].mxu0  ;;  %v1229_v24 = vadd.f32 %v1506_v17, %v1228_v18 }
 0x46f   : > { %v1240_v22 = vadd.f32 %v1731_v19, %v1506_v17  ;;  %v1231_v23 = vpop.f32.mrb[43].mxu0 }
 0x470   : > { %v1232_v38 = vadd.f32 %v1506_v17, %v1231_v23 }
 0x471   : > { %v1244_v25 = vpack.c.bf16 %v1240_v22, %v1237_v21 }
 0x472   : > { %v1243_v26 = vpack.c.bf16 %v1232_v38, %v1229_v24 }
 0x474   : > { %1736 = vmatprep.mubr.msk.bf16.mxu0 %vm1187_vm2, %v1243_v26 }
 0x475   : > { %1737 = vmatmul.mubr.msk.bf16.vlgmr.msra.gmra.mrb[44].mxu0 %vm1187_vm2, %v1244_v25 }
 0x548   : > { %v1738_v29 = vpop.f32.mrb[44].mxu0 }
 0x549   : > { %v1317_v30 = vadd.f32 %v1738_v29, %v1511_v28  ;;  %v1308_v31 = vpop.f32.mrb[45].mxu0 }
 0x54a   : > { %v1309_v33 = vadd.f32 %v1511_v28, %v1308_v31  ;;  %v1739_v34 = vpop.f32.mrb[46].mxu0 }
 0x54b   : > { %1325 = vst [vmem:[%s385_s26 + $0x10] sm:$0xff] %v1317_v30  ;;  %v1320_v35 = vadd.f32 %v1739_v34, %v1511_v28  ;;  %v1311_v36 = vpop.f32.mrb[47].mxu0 }
 0x54c   : > { %1323 = vst [vmem:[%s385_s26] sm:$0xff] %v1309_v33  ;;  %v1312_v49 = vadd.f32 %v1511_v28, %v1311_v36 }
 0x54d   : > { %1326 = vst [vmem:[%s385_s26 + $0x18] sm:$0xff] %v1320_v35 }
 0x54e   : > { %1324 = vst [vmem:[%s385_s26 + $0x8] sm:$0xff] %v1312_v49 }
 0x54f   : > { %1892 = shalt.err (!%p1889_p4)
}
 0x550   : > { %s1893_s27 = scalar_lea.hbm %s2315_s23, 512  ;;  %s1897_s20 = scalar_lea.hbm %s2368_s9, 1024 }
 0x551   : > { %p1894_p5 = scmp.ne.s32.totalorder %s2315_s23, %s1893_s27  ;;  %p1898_p1 = scmp.lt.u32.totalorder %s2315_s23, %s2368_s9 }
 0x552   : > { %p1899_p3 = scmp.lt.u32.totalorder %s1897_s20, %s1893_s27  ;;  %p1901_p6 = scmp.lt.u32.totalorder %s1893_s27, %s2315_s23 }
 0x553   : > { %p1895_p7 = pnand %p1894_p5, %p2375_p12 }
 0x554   : > { %p1900_p11 = por %p1899_p3, %p1898_p1 }
 0x555   : > { %p1896_p9 = pneg %p1895_p7 }
 0x556   : > { %p1902_p13 = por %p1901_p6, %p1900_p11 }
 0x558   : > { %p1903_p8 = pnand %p1902_p13, %p1896_p9 }
 0x55a   : > { %1906 = shalt.err (!%p1903_p8)
}
 0x55b   : > { %s1951_s16 = smov 128   ;;  %s1952_s14 = smov 8  }
 0x55c   : > { %1743 = dma.vmem_to_hbm [thread:$0]  (%p2375_p12), %s2310_s25, 512, %s2315_s23, %s1328_s13, %s1951_s16, %s1951_s16, %s1952_s14  }
 0x55d PF: > { %s1356_s17 = sand.u32 1, %s1933_s30   ;;  %p2376_p10 = scmp.ne.s32.totalorder %s2373_s22, 0 }
 0x55e   : > { %p2377_p0 = scmp.ge.s32.totalorder %s1945_s12, 2  ;;  %s1357_s27 = scalar_lea.sflag [#allocation4], %s1356_s17 }
 0x560   : > { %p1750_p2 = pnand %p2377_p0, %p2376_p10 }
 0x562   : > { %1928 = dma.done.wait (!%p1750_p2), %s1357_s27, 512  }
 0x563   : > { %1930 = vsyncadd (!%p1750_p2), %s1357_s27, 4294966784  ;;  %p22_p4 = scmp.ge.s32.totalorder %s2028_s15, 4   ;;  %s2378_s30 = smov %s1937_s10 }
 0x564   : > { %s2379_s10 = smov %s1941_s11  ;;  %s2380_s11 = smov %s2040_s18 }
 0x565   : > { %s2381_s12 = smov %s2028_s15  ;;  %24 = sbr.rel (!%p22_p4) target bundleno = 5 (0x5), region = 107 }
 0x56c   :  { %1362 = vsyncpa [#allocation3], 1 }
 0x56d   :  { %1364 = vsyncpa [#allocation3 + $0x1], 1 }
 0x56e   :  { %1365 = vsyncpa [#allocation4], 1 }
 0x56f   :  { %1367 = vsyncpa [#allocation4 + $0x1], 1 }

</bundles_post_ra>
